<compile_context>
chip_gen: v5e
topology: v5e:2x2
jax: 0.10.0
libtpu: 0.0.40
codegen_flags: <defaults>
</compile_context>

<pallas_src>
import functools

import jax
import jax.numpy as jnp
from jax.experimental import pallas as pl
from jax.experimental.pallas import tpu as pltpu

_LANE = 128
# Minimum sublane granularity by element size (f32 -> 8, bf16 -> 16, int8 -> 32).
_SUBLANE_BY_ITEMSIZE = {4: 8, 2: 16, 1: 32}
_TARGET_BLOCK_BYTES = 4 * 1024 * 1024  # ~4 MiB per block (dtype-independent)


def _sigmoid_add_sigmoid_kernel(x_ref, o_ref, *, compute_dtype):
    # y = sigmoid(sigmoid(x) + sigmoid(x)) = sigmoid(2 * sigmoid(x))
    # sigmoid(z) = 0.5 * tanh(0.5 * z) + 0.5 -> two tanh (EUP) ops total,
    # remaining work is cheap VPU fma's.
    x = x_ref[...].astype(compute_dtype)
    s = 0.5 * jnp.tanh(0.5 * x) + 0.5          # sigmoid(x)
    y = 0.5 * jnp.tanh(s) + 0.5                # sigmoid(2 * sigmoid(x))
    o_ref[...] = y.astype(o_ref.dtype)


def _compute_dtype_for(in_dtype) -> jnp.dtype:
    """bf16 math on chips with bf16 VPU/EUP (v6e+); f32 everywhere else."""
    if jnp.dtype(in_dtype) == jnp.dtype(jnp.bfloat16):
        try:
            kind = jax.devices()[0].device_kind.lower()
        except Exception:  # pragma: no cover - be conservative
            kind = ""
        if not any(v in kind for v in ("v2", "v3", "v4", "v5")):
            return jnp.bfloat16
    return jnp.float32


def _round_up(n: int, m: int) -> int:
    return ((n + m - 1) // m) * m


def sigmoid_add_sigmoid(x: jax.Array) -> jax.Array:
    """Elementwise sigmoid(sigmoid(x) + sigmoid(x)) via a Pallas TPU kernel."""
    orig_shape = x.shape
    orig_dtype = x.dtype

    n_elem = x.size
    if n_elem == 0:
        return x

    itemsize = jnp.dtype(orig_dtype).itemsize
    if itemsize not in _SUBLANE_BY_ITEMSIZE:
        raise ValueError(
            f"Unsupported element size {itemsize} bytes for dtype {orig_dtype}"
        )
    sublane = _SUBLANE_BY_ITEMSIZE[itemsize]

    # Flatten to a lane-dense slab. Only the last (lane) dim has to be exactly
    # 128; ragged row blocks are masked by Pallas, so padding is needed only
    # when the flat size is not a multiple of 128 (rare for real shapes).
    rem = n_elem % _LANE
    pad = (_LANE - rem) if rem else 0
    x_flat = jnp.ravel(x)
    if pad:
        # TODO(synk): for the (<128-element) unaligned tail this still costs a
        # full-tensor pad+slice round trip; could be fused via allow_input_fusion.
        x_flat = jnp.pad(x_flat, (0, pad))
    rows = (n_elem + pad) // _LANE
    x2d = x_flat.reshape(rows, _LANE)

    if rows <= sublane:
        # Tiny input: a single full-extent block is always a legal BlockSpec.
        tile_rows = rows
    else:
        # ~4 MiB blocks regardless of dtype (constant-byte blocks keep DMA
        # efficiency identical across f32/bf16/int8).
        target_rows = max(sublane, _TARGET_BLOCK_BYTES // (_LANE * itemsize))
        target_rows = (target_rows // sublane) * sublane
        # Keep at least 2 grid steps so the "parallel" axis can shard across
        # v7x's two TensorCores (no-op on single-TC v5e/v6e).
        half_rows = _round_up(pl.cdiv(rows, 2), sublane)
        tile_rows = min(target_rows, half_rows)

    grid = (pl.cdiv(rows, tile_rows),)  # ragged last block: Pallas masks writes

    kernel = functools.partial(
        _sigmoid_add_sigmoid_kernel,
        compute_dtype=_compute_dtype_for(orig_dtype),
    )

    out2d = pl.pallas_call(
        kernel,
        out_shape=jax.ShapeDtypeStruct((rows, _LANE), orig_dtype),
        grid_spec=pltpu.PrefetchScalarGridSpec(
            num_scalar_prefetch=0,
            grid=grid,
            in_specs=[pl.BlockSpec((tile_rows, _LANE), lambda i: (i, 0))],
            out_specs=pl.BlockSpec((tile_rows, _LANE), lambda i: (i, 0)),
        ),
        compiler_params=pltpu.CompilerParams(
            dimension_semantics=("parallel",),
            # 4 MiB blocks double-buffered on input + output = 16 MiB, which is
            # exactly v5e's scoped default; raise it so all generations accept.
            vmem_limit_bytes=32 * 1024 * 1024,
        ),
    )(x2d)

    out_flat = out2d.reshape(-1)
    if pad:
        out_flat = out_flat[:n_elem]
    return out_flat.reshape(orig_shape)


if __name__ == "__main__":
    key = jax.random.PRNGKey(0)
    # Small NCHW input consistent with the module (elementwise; any shape works).
    x = jax.random.normal(key, (2, 4, 16, 16), dtype=jnp.float32)

    y = sigmoid_add_sigmoid(x)
    y = jax.block_until_ready(y)

    # Reference check in plain JAX (exp-based sigmoid).
    s = jax.nn.sigmoid(x)
    y_ref = jax.nn.sigmoid(s + s)
    assert y.shape == x.shape and y.dtype == x.dtype
    assert jnp.allclose(y, y_ref, atol=2e-6, rtol=2e-6)

    print("KERNEL_OK")
</pallas_src>

<mosaic_0001>
module attributes {stable_mosaic.version = 11 : i64} {
  func.func @_sigmoid_add_sigmoid_kernel(%arg0: i32, %arg1: memref<8x128xf32, #tpu.memory_space<vmem>>, %arg2: memref<8x128xf32, #tpu.memory_space<vmem>>) attributes {dimension_semantics = [#tpu.dimension_semantics<parallel>], iteration_bounds = array<i64: 2>, scalar_prefetch = 0 : i64, scratch_operands = 0 : i64, tpu.core_type = #tpu.core_type<tc>, window_params = [{transform_indices = @transform_0, window_bounds = array<i64: 8, 128>}, {transform_indices = @transform_1, window_bounds = array<i64: 8, 128>}]} {
    %c0 = arith.constant 0 : index
    %c0_0 = arith.constant 0 : index
    %0 = vector.load %arg1[%c0, %c0_0] : memref<8x128xf32, #tpu.memory_space<vmem>>, vector<8x128xf32>
    %cst = arith.constant 5.000000e-01 : f32
    %1 = vector.broadcast %cst : f32 to vector<8x128xf32>
    %2 = arith.mulf %1, %0 : vector<8x128xf32>
    %3 = math.tanh %2 : vector<8x128xf32>
    %cst_1 = arith.constant 5.000000e-01 : f32
    %4 = vector.broadcast %cst_1 : f32 to vector<8x128xf32>
    %5 = arith.mulf %4, %3 : vector<8x128xf32>
    %cst_2 = arith.constant 5.000000e-01 : f32
    %6 = vector.broadcast %cst_2 : f32 to vector<8x128xf32>
    %7 = arith.addf %5, %6 : vector<8x128xf32>
    %8 = math.tanh %7 : vector<8x128xf32>
    %cst_3 = arith.constant 5.000000e-01 : f32
    %9 = vector.broadcast %cst_3 : f32 to vector<8x128xf32>
    %10 = arith.mulf %9, %8 : vector<8x128xf32>
    %cst_4 = arith.constant 5.000000e-01 : f32
    %11 = vector.broadcast %cst_4 : f32 to vector<8x128xf32>
    %12 = arith.addf %10, %11 : vector<8x128xf32>
    %c0_5 = arith.constant 0 : index
    %c0_6 = arith.constant 0 : index
    %13 = vector.load %arg2[%c0_5, %c0_6] : memref<8x128xf32, #tpu.memory_space<vmem>>, vector<8x128xf32>
    tpu.vector_store %arg2[%c0_5, %c0_6], %12 {strides = array<i32>} : memref<8x128xf32, #tpu.memory_space<vmem>>, vector<8x128xf32>,
    return
  }
  func.func @transform_0(%arg0: i32) -> (i32, i32) {
    %c0_i32 = arith.constant 0 : i32
    %c0_i32_0 = arith.constant 0 : i32
    return %arg0, %c0_i32 : i32, i32
  }
  func.func @transform_1(%arg0: i32) -> (i32, i32) {
    %c0_i32 = arith.constant 0 : i32
    %c0_i32_0 = arith.constant 0 : i32
    return %arg0, %c0_i32 : i32, i32
  }
}

</mosaic_0001>

<bundles_post_ra>
// kernel: tpu_custom_call.1
= control target key start
LH: loop header
LB: loop body
LE: loop exit
PB: predicated region body
PF: predicated region fallthrough
CT: control target
= control target key end

     0   :  { %6 = vsyncpa [#allocation3], 0  ;;  %s526_s0 = inlined_call_operand.hbm [shape: f32[16,128], index: 0, kind: input, shape index: {}]   ;;  %s527_s1 = inlined_call_operand.hbm [shape: f32[16,128], index: 1, kind: output, shape index: {}]  }
   0x1   :  { %8 = vsyncpa [#allocation3 + $0x1], 0 }
   0x2   :  { %9 = vsyncpa [#allocation4], 0 }
   0x3   :  { %11 = vsyncpa [#allocation4 + $0x1], 0  ;;  %s399_s6 = smov 0   ;;  %s401_s7 = smov 0  }
   0x4   :  { %s403_s8 = smov 0   ;;  %s405_s9 = smov 0  }
   0x5 LB: > { %s420_s10 = sadd.s32 4294967295, %s387_s9   ;;  %s229_s11 = sadd.s32 4294967294, %s387_s9   ;;  %s387_s9 = sphi %s405_s9, %s537_s9   ;;  %s383_s8 = sphi %s403_s8, %s536_s8   ;;  %s379_s7 = sphi %s401_s7, %s535_s7   ;;  %s375_s6 = sphi %s399_s6, %s534_s6  }
   0x6   : > { %s424_s12 = sadd.s32 1, %s387_s9   ;;  %s24_s13 = sadd.s32 1, %s383_s8 }
   0x7   : > { %s21_s14 = ssub.s32 %s387_s9, %s424_s12  ;;  %p31_p0 = scmp.ne.s32.totalorder %s383_s8, %s379_s7 }
   0x8   : > { %p22_p1 = scmp.eq.s32.totalorder %s21_s14, 0  ;;  %p32_p2 = scmp.eq.s32.totalorder %s387_s9, 0 }
   0x9   : > { %p37_p3 = scmp.ne.s32.totalorder %s379_s7, %s375_s6  ;;  %p38_p4 = scmp.eq.s32.totalorder %s420_s10, 0 }
   0xa   : > { %s436_s15 = scalar_select %p22_p1, %s383_s8, %s24_s13  }
   0xb   : > { %p438_p5 = por %p32_p2, %p31_p0  ;;  %p442_p6 = por %p38_p4, %p37_p3 }
   0xc   : > { %p61_p7 = scmp.eq.s32.totalorder %s420_s10, 1  ;;  %p67_p8 = scmp.eq.s32.totalorder %s229_s11, 1 }
   0xd   : > { %p253_p10 = scmp.lt.s32.totalorder %s387_s9, 2  ;;  %s87_s20 = sand.u32 1, %s383_s8  }
   0xe   : > { %p449_p11 = por %p61_p7, %p31_p0  ;;  %p453_p12 = por %p67_p8, %p37_p3 }
   0xf   : > { %s233_s21 = sshll.u32 %s387_s9, 3  ;;  %s232_s22 = sshll.u32 %s87_s20, 3 }
  0x10   : > { %s95_s25 = scalar_lea.hbm %s526_s0, %s233_s21  ;;  %s91_s27 = scalar_lea.vmem [#allocation2], %s232_s22 }
  0x11   : > { %s97_s26 = sshll.u32 %s95_s25, 4  ;;  %s99_s28 = sshll.u32 %s91_s27, 4  ;;  %s98_s26 = int_to_ptr.hbm [resolvable:$true] %s97_s26  ;;  %s100_s28 = int_to_ptr.vmem [resolvable:$true] %s99_s28 }
  0x12   : > { %p464_p13 = pnand %p253_p10, %p438_p5  ;;  %p234_p0 = scmp.ge.s32.totalorder %s387_s9, 1 }
  0x13   : > { %p104_p1 = scmp.lt.s32.totalorder %s387_s9, 3  ;;  %s88_s30 = scalar_lea.sflag [#allocation3], %s87_s20 }
  0x14   : > { %s291_s2 = sshra.s32 %s98_s26, 4  ;;  %p295_p3 = pneg %p464_p13  ;;  %s292_s2 = int_to_ptr.hbm [resolvable:$true] %s291_s2 }
  0x15   : > { %s293_s3 = scalar_lea.hbm %s292_s2, 8  ;;  %s298_s11 = scalar_lea.hbm %s526_s0, 16 }
  0x16   : > { %p294_p2 = scmp.ne.s32.totalorder %s292_s2, %s293_s3  ;;  %p299_p5 = scmp.lt.s32.totalorder %s292_s2, %s526_s0 }
  0x17   : > { %p300_p8 = scmp.lt.s32.totalorder %s298_s11, %s293_s3 }
  0x18   : > { %p296_p4 = pnand %p295_p3, %p294_p2 }
  0x19   : > { %p301_p10 = por %p300_p8, %p299_p5 }
  0x1a   : > { %p297_p7 = pneg %p296_p4 }
  0x1c   : > { %p302_p9 = pnand %p301_p10, %p297_p7 }
  0x1e   : > { %305 = shalt.err (!%p302_p9)
}
  0x1f   : > { %248 = dma.hbm_to_vmem [thread:$0]  (!%p464_p13), %s98_s26, 128, %s100_s28, %s88_s30  }
  0x20   : > { %p105_p2 = pnand %p234_p0, %p104_p1 }
  0x21   : > { %s485_s16 = sand.u32 (!%p105_p2), 1, %s379_s7  }
  0x22   : > { %108 = sbr.rel (%p105_p2) target bundleno = 68 (0x44), region = 24  ;;  %s235_s20 = sshll.u32 (!%p105_p2), %s485_s16, 3 }
  0x23   : > { %s111_s21 = scalar_lea.sflag (!%p105_p2), [#allocation3], %s485_s16  ;;  %s114_s22 = scalar_lea.vmem (!%p105_p2), [#allocation2], %s235_s20 }
  0x27   : > { %366 = dma.done.wait (%p442_p6), %s111_s21, 128  }
  0x28   : > { %368 = vsyncadd (%p442_p6), %s111_s21, 4294967168  ;;  %v134_v0 = vld [vmem:[%s114_s22] sm:$0xff]  ;;  %s238_s23 = sshll.u32 %s420_s10, 3  ;;  %s133_s27 = scalar_lea.vmem [#allocation5], %s235_s20 }
  0x29   : > { %v135_v1 = vmul.f32 0.5, %v134_v0  ;;  %s154_s26 = scalar_lea.hbm %s527_s1, %s238_s23  ;;  %s156_s28 = sshll.u32 %s133_s27, 4  ;;  %s157_s28 = int_to_ptr.vmem [resolvable:$true] %s156_s28 }
  0x2a   : > { %s158_s17 = sshll.u32 %s154_s26, 4  ;;  %s144_s29 = scalar_lea.sflag [#allocation4], %s485_s16  ;;  %s159_s17 = int_to_ptr.hbm [resolvable:$true] %s158_s17 }
  0x2b   : > { %287 = vtanh.f32 %v135_v1  ;;  %s335_s30 = sshra.s32 %s159_s17, 4  ;;  %s341_s4 = scalar_lea.hbm %s527_s1, 16  ;;  %s336_s30 = int_to_ptr.hbm [resolvable:$true] %s335_s30 }
  0x2c   : > { %s337_s2 = scalar_lea.hbm %s336_s30, 8  ;;  %p342_p0 = scmp.lt.s32.totalorder %s336_s30, %s527_s1 }
  0x2d   : > { %p338_p6 = scmp.ne.s32.totalorder %s336_s30, %s337_s2  ;;  %p343_p1 = scmp.lt.s32.totalorder %s341_s4, %s337_s2 }
  0x2f   : > { %p339_p9 = pnand %p338_p6, %p449_p11  ;;  %p344_p3 = por %p343_p1, %p342_p0 }
  0x31   : > { %v288_v2 = vpop.eup %287  ;;  %p340_p13 = pneg %p339_p9 }
  0x32   : > { %v137_v3 = vmul.f32 0.5, %v288_v2 }
  0x33   : > { %p345_p4 = pnand %p344_p3, %p340_p13 }
  0x34   : > { %v138_v4 = vadd.f32 0.5, %v137_v3 }
  0x36   : > { %289 = vtanh.f32 %v138_v4 }
  0x3c   : > { %v290_v5 = vpop.eup %289 }
  0x3d   : > { %v140_v6 = vmul.f32 0.5, %v290_v5 }
  0x3f   : > { %v141_v7 = vadd.f32 0.5, %v140_v6 }
  0x41   : > { %142 = vst [vmem:[%s133_s27] sm:$0xff] %v141_v7 }
  0x42   : > { %348 = shalt.err (!%p345_p4)
}
  0x43   : > { %243 = dma.vmem_to_hbm [thread:$0]  (%p449_p11), %s157_s28, 128, %s159_s17, %s144_s29  }
  0x44 PF: > { %s170_s13 = sand.u32 1, %s375_s6   ;;  %p533_p7 = scmp.ge.s32.totalorder %s387_s9, 2 }
  0x45   : > { %s171_s14 = scalar_lea.sflag [#allocation4], %s170_s13 }
  0x46   : > { %p250_p5 = pnand %p533_p7, %p453_p12 }
  0x48   : > { %p251_p8 = pneg %p250_p5 }
  0x4a   : > { %370 = dma.done.wait (%p251_p8), %s171_s14, 128  }
  0x4b   : > { %372 = vsyncadd (%p251_p8), %s171_s14, 4294967168  ;;  %p14_p10 = scmp.ge.s32.totalorder %s424_s12, 4   ;;  %s534_s6 = smov %s379_s7 }
  0x4c   : > { %s535_s7 = smov %s383_s8  ;;  %s536_s8 = smov %s436_s15 }
  0x4d   : > { %s537_s9 = smov %s424_s12  ;;  %16 = sbr.rel (!%p14_p10) target bundleno = 5 (0x5), region = 69 }
  0x52   :  { %177 = vsyncpa [#allocation3], 1 }
  0x53   :  { %179 = vsyncpa [#allocation3 + $0x1], 1 }
  0x54   :  { %180 = vsyncpa [#allocation4], 1 }
  0x55   :  { %182 = vsyncpa [#allocation4 + $0x1], 1 }

</bundles_post_ra>
